<compile_context>
chip_gen: v5e
topology: v5e:2x2
jax: 0.10.0
libtpu: 0.0.40
codegen_flags: <defaults>
</compile_context>

<pallas_src>
import functools

import jax
import jax.numpy as jnp
from jax.experimental import pallas as pl
from jax.experimental.pallas import tpu as pltpu


_VMEM_LIMIT = 32 * 1024 * 1024     # valid on v5e/v6e (128 MiB phys) and v7x (64 MiB phys)
_VMEM_BUDGET = 24 * 1024 * 1024    # per-call working-set budget used by the tile chooser


def _round_up(x, m):
    return ((x + m - 1) // m) * m


def _row_tile(m, target, bytes_per_row, fixed_bytes=0, budget=_VMEM_BUDGET):
    """Largest multiple-of-8 row tile <= target that fits the VMEM budget.

    Keeps >= 2 grid steps when M allows it (both v7x TensorCores stay busy)."""
    cap = max(8, int((budget - fixed_bytes) // max(bytes_per_row, 1)))
    tile = max(8, (min(target, cap) // 8) * 8)
    if m <= tile:
        if m >= 16 and m % 8 == 0:
            return max(8, _round_up(m // 2, 8))   # split into 2 steps for megacore
        return m
    return tile


# ---------------------------------------------------------------------------
# Kernels
# ---------------------------------------------------------------------------
def _stats_kernel(x_ref, stats_ref, *, length_ratio):
    # x_ref: (TM, L) -- one row per (batch, channel) series, time on the lane axis.
    x = x_ref[...]
    n = x.shape[-1]
    mean = jnp.mean(x, axis=-1, keepdims=True)
    xc = x - mean
    # torch.var(dim=1) is unbiased (ddof=1); +1e-5 like the reference.
    var = jnp.sum(xc * xc, axis=-1, keepdims=True) * (1.0 / (n - 1)) + 1e-5
    std = jnp.sqrt(var)
    # Packed stats (one lane-dense (TM, 2) output): the two values are exactly the
    # coefficients of the two extra rows of the augmented weight matrix in kernel 2.
    stats_ref[:, 0:1] = std * length_ratio     # sigma * length_ratio  (bias de-norm)
    stats_ref[:, 1:2] = mean * float(n)        # mean  * L             (DC / mean fold)


def _freq_upsample_kernel(x_ref, w_ref, out_ref):
    # x_ref: (TM, 2F+2) = [re | im | sigma*lr | mean*L],  w_ref: (2F+2, 2*W_pad).
    # Normalization / bias / de-normalization / DC mean correction are all folded into
    # w_ref on the host, so the kernel is a single MXU matmul with no epilogue.
    out_ref[...] = jnp.dot(x_ref[...], w_ref[...], preferred_element_type=jnp.float32)


# ---------------------------------------------------------------------------
# Forward pass
# ---------------------------------------------------------------------------
def fits_forward(history_data, params, *, seq_len, pred_len, cut_freq):
    B, L, N, _ = history_data.shape
    assert L == seq_len
    assert cut_freq <= seq_len // 2 + 1, "cut_freq must not exceed #rfft bins"
    total_len = seq_len + pred_len
    length_ratio = total_len / seq_len
    n_freq_out = total_len // 2 + 1
    M = B * N

    # channel-major: [B, L, N] -> [M, L].  XLA does this single transpose; it is the
    # layout the FFT needs anyway, and kernel 1 / rfft both read the transposed copy.
    x_t = jnp.transpose(history_data[..., 0].astype(jnp.float32), (0, 2, 1)).reshape(M, L)

    # -- Pallas kernel 1: per-series stats only (normalized copy never written) -------
    tm1 = _row_tile(M, 1024, bytes_per_row=8 * (L + 2))
    stats = pl.pallas_call(
        functools.partial(_stats_kernel, length_ratio=float(length_ratio)),
        grid=(pl.cdiv(M, tm1),),
        in_specs=[pl.BlockSpec((tm1, L), lambda i: (i, 0))],
        out_specs=pl.BlockSpec((tm1, 2), lambda i: (i, 0)),
        out_shape=jax.ShapeDtypeStruct((M, 2), jnp.float32),
        compiler_params=pltpu.CompilerParams(
            dimension_semantics=("parallel",), vmem_limit_bytes=_VMEM_LIMIT),
    )(x_t)

    # TODO(synk): FFT has no Pallas TPU primitive; rfft/irfft stay as XLA ops.
    spec = jnp.fft.rfft(x_t, axis=-1)[:, :cut_freq]          # (M, F) complex64, raw/un-normalized
    x_aug = jnp.concatenate(
        [jnp.real(spec), jnp.imag(spec), stats], axis=-1)    # (M, 2F+2) float32

    # ---- host-side augmented weight: complex linear + bias + (de)normalization fold --
    wr, wi = params["w_real"], params["w_imag"]              # (F, Fo), x @ W layout
    br, bi = params["b_real"], params["b_imag"]              # (1, Fo)
    Fo = wr.shape[1]
    # Half-width of the output slab: >= n_freq_out (no jnp.pad before irfft) and a
    # 128-multiple (unmasked lane-dense stores).  Taking max(..., Fo) also gracefully
    # clamps the cut_freq_out > n_freq_out edge case (extra columns are cropped).
    w_pad = _round_up(max(n_freq_out, Fo), 128)
    lr = jnp.float32(length_ratio)
    pad = [(0, 0), (0, w_pad - Fo)]
    wr_p, wi_p = jnp.pad(wr, pad), jnp.pad(wi, pad)          # (F, w_pad)
    br_p, bi_p = jnp.pad(br, pad), jnp.pad(bi, pad)          # (1, w_pad)
    top = lr * jnp.concatenate([wr_p, wi_p], axis=1)         # re rows:  lr*[ Wr | Wi]
    bot = lr * jnp.concatenate([-wi_p, wr_p], axis=1)        # im rows:  lr*[-Wi | Wr]
    bias_row = jnp.concatenate([br_p - bi_p, br_p + bi_p], axis=1)     # * sigma*lr
    e0 = jnp.zeros((1, 2 * w_pad), jnp.float32).at[0, 0].set(1.0)
    mean_row = lr * e0 - top[0:1]                            # * mean*L  (DC correction)
    w_aug = jnp.concatenate([top, bot, bias_row, mean_row], axis=0)    # (2F+2, 2*w_pad)

    # -- Pallas kernel 2: one MXU matmul producing the full padded spectrum slab -------
    K = 2 * cut_freq + 2
    tm2 = _row_tile(M, 2048, bytes_per_row=8 * (K + 2 * w_pad),
                    fixed_bytes=16 * K * w_pad)
    out = pl.pallas_call(
        _freq_upsample_kernel,
        grid=(pl.cdiv(M, tm2),),
        in_specs=[pl.BlockSpec((tm2, K), lambda i: (i, 0)),
                  pl.BlockSpec((K, 2 * w_pad), lambda i: (0, 0))],
        out_specs=pl.BlockSpec((tm2, 2 * w_pad), lambda i: (i, 0)),
        out_shape=jax.ShapeDtypeStruct((M, 2 * w_pad), jnp.float32),
        compiler_params=pltpu.CompilerParams(
            dimension_semantics=("parallel",), vmem_limit_bytes=_VMEM_LIMIT),
    )(x_aug, w_aug)

    # complex assembly (cropping the lane padding) + inverse rFFT on the lane axis.
    out3 = out.reshape(M, 2, w_pad)
    spec_full = jax.lax.complex(out3[:, 0, :n_freq_out], out3[:, 1, :n_freq_out])
    xy = jnp.fft.irfft(spec_full, n=total_len, axis=-1)      # (M, total_len) float32

    # prediction horizon only, back to [B, pred_len, N, 1]
    y = xy[:, L:].reshape(B, N, pred_len)
    return jnp.transpose(y, (0, 2, 1))[..., None]


# ---------------------------------------------------------------------------
# Plain-JAX transcription of the PyTorch reference (for a numeric sanity check)
# ---------------------------------------------------------------------------
def fits_reference(history_data, params, *, seq_len, pred_len, cut_freq):
    x = history_data[..., 0].astype(jnp.float32)             # (B, L, N)
    total_len = seq_len + pred_len
    length_ratio = total_len / seq_len
    n_freq_out = total_len // 2 + 1
    mean = jnp.mean(x, axis=1, keepdims=True)
    xc = x - mean
    var = jnp.var(xc, axis=1, keepdims=True, ddof=1) + 1e-5
    xn = xc / jnp.sqrt(var)
    spec = jnp.fft.rfft(xn, axis=1)[:, :cut_freq, :]
    re, im = jnp.real(spec), jnp.imag(spec)
    wr, wi = params["w_real"], params["w_imag"]
    br, bi = params["b_real"], params["b_imag"]

    def lin(z, w, b):                                        # z: (B, F, N) -> (B, Fo, N)
        zt = jnp.transpose(z, (0, 2, 1))
        return jnp.transpose(zt @ w + b, (0, 2, 1))

    real_up = lin(re, wr, br) - lin(im, wi, bi)
    imag_up = lin(im, wr, br) + lin(re, wi, bi)
    Fo = real_up.shape[1]
    R = jnp.zeros((x.shape[0], n_freq_out, x.shape[2]), jnp.float32).at[:, :Fo, :].set(real_up)
    I = jnp.zeros((x.shape[0], n_freq_out, x.shape[2]), jnp.float32).at[:, :Fo, :].set(imag_up)
    low_xy = jnp.fft.irfft(R + 1j * I, n=total_len, axis=1)
    xy = low_xy * length_ratio * jnp.sqrt(var) + mean
    return xy[:, seq_len:, :][..., None]


# ---------------------------------------------------------------------------
# Example run
# ---------------------------------------------------------------------------
if __name__ == "__main__":
    B, seq_len, pred_len, N, C = 2, 16, 16, 4, 1
    cut_freq = 5                                   # <= seq_len // 2 + 1
    length_ratio = (seq_len + pred_len) / seq_len
    cut_freq_out = int(cut_freq * length_ratio)

    key = jax.random.PRNGKey(0)
    k_x, k_wr, k_wi, k_br, k_bi = jax.random.split(key, 5)
    history_data = jax.random.normal(k_x, (B, seq_len, N, C), dtype=jnp.float32)

    # nn.Linear-style init; weights stored already transposed to (in, out) for x @ W.
    bound = float(1.0 / (cut_freq ** 0.5))
    params = {
        "w_real": jax.random.uniform(k_wr, (cut_freq, cut_freq_out), jnp.float32, -bound, bound),
        "w_imag": jax.random.uniform(k_wi, (cut_freq, cut_freq_out), jnp.float32, -bound, bound),
        "b_real": jax.random.uniform(k_br, (1, cut_freq_out), jnp.float32, -bound, bound),
        "b_imag": jax.random.uniform(k_bi, (1, cut_freq_out), jnp.float32, -bound, bound),
    }

    fits_jit = jax.jit(fits_forward, static_argnames=("seq_len", "pred_len", "cut_freq"))
    y = fits_jit(history_data, params,
                 seq_len=seq_len, pred_len=pred_len, cut_freq=cut_freq)
    jax.block_until_ready(y)
    assert y.shape == (B, pred_len, N, 1), y.shape

    # numeric sanity check against the plain-JAX transcription of the PyTorch module
    y_ref = fits_reference(history_data, params,
                           seq_len=seq_len, pred_len=pred_len, cut_freq=cut_freq)
    err = float(jnp.max(jnp.abs(y - y_ref)))
    assert err < 5e-2, f"max abs error vs reference: {err}"
    print("KERNEL_OK")
</pallas_src>

<mosaic_0001>
module attributes {stable_mosaic.version = 11 : i64} {
  func.func @_stats_kernel(%arg0: i32, %arg1: memref<8x16xf32, #tpu.memory_space<vmem>>, %arg2: memref<8x2xf32, #tpu.memory_space<vmem>>) attributes {dimension_semantics = [#tpu.dimension_semantics<parallel>], iteration_bounds = array<i64: 1>, scalar_prefetch = 0 : i64, scratch_operands = 0 : i64, tpu.core_type = #tpu.core_type<tc>, window_params = [{transform_indices = @transform_0, window_bounds = array<i64: 8, 16>}, {transform_indices = @transform_1, window_bounds = array<i64: 8, 2>}]} {
    %c0 = arith.constant 0 : index
    %c0_0 = arith.constant 0 : index
    %0 = vector.load %arg1[%c0, %c0_0] : memref<8x16xf32, #tpu.memory_space<vmem>>, vector<8x16xf32>
    %cst = arith.constant dense<0.000000e+00> : vector<8xf32>
    %1 = vector.multi_reduction <add>, %0, %cst [1] : vector<8x16xf32> to vector<8xf32>
    %2 = vector.shape_cast %1 : vector<8xf32> to vector<8x1xf32>
    %cst_1 = arith.constant 1.600000e+01 : f32
    %3 = vector.broadcast %cst_1 : f32 to vector<8x1xf32>
    %4 = arith.divf %2, %3 : vector<8x1xf32>
    %5 = vector.broadcast %4 : vector<8x1xf32> to vector<8x16xf32>
    %6 = arith.subf %0, %5 : vector<8x16xf32>
    %7 = arith.mulf %6, %6 : vector<8x16xf32>
    %cst_2 = arith.constant dense<0.000000e+00> : vector<8xf32>
    %8 = vector.multi_reduction <add>, %7, %cst_2 [1] : vector<8x16xf32> to vector<8xf32>
    %9 = vector.shape_cast %8 : vector<8xf32> to vector<8x1xf32>
    %cst_3 = arith.constant 0.0666666701 : f32
    %10 = vector.broadcast %cst_3 : f32 to vector<8x1xf32>
    %11 = arith.mulf %9, %10 : vector<8x1xf32>
    %cst_4 = arith.constant 9.99999974E-6 : f32
    %12 = vector.broadcast %cst_4 : f32 to vector<8x1xf32>
    %13 = arith.addf %11, %12 : vector<8x1xf32>
    %14 = math.sqrt %13 : vector<8x1xf32>
    %cst_5 = arith.constant 2.000000e+00 : f32
    %15 = vector.broadcast %cst_5 : f32 to vector<8x1xf32>
    %16 = arith.mulf %14, %15 : vector<8x1xf32>
    %c0_6 = arith.constant 0 : index
    %c0_7 = arith.constant 0 : index
    %17 = vector.load %arg2[%c0_6, %c0_7] : memref<8x2xf32, #tpu.memory_space<vmem>>, vector<8x1xf32>
    tpu.vector_store %arg2[%c0_6, %c0_7], %16 {strides = array<i32>} : memref<8x2xf32, #tpu.memory_space<vmem>>, vector<8x1xf32>,
    %cst_8 = arith.constant 1.600000e+01 : f32
    %18 = vector.broadcast %cst_8 : f32 to vector<8x1xf32>
    %19 = arith.mulf %4, %18 : vector<8x1xf32>
    %c0_9 = arith.constant 0 : index
    %c1 = arith.constant 1 : index
    %20 = vector.load %arg2[%c0_9, %c1] : memref<8x2xf32, #tpu.memory_space<vmem>>, vector<8x1xf32>
    tpu.vector_store %arg2[%c0_9, %c1], %19 {strides = array<i32>} : memref<8x2xf32, #tpu.memory_space<vmem>>, vector<8x1xf32>,
    return
  }
  func.func @transform_0(%arg0: i32) -> (i32, i32) {
    %c0_i32 = arith.constant 0 : i32
    %c0_i32_0 = arith.constant 0 : i32
    return %arg0, %c0_i32 : i32, i32
  }
  func.func @transform_1(%arg0: i32) -> (i32, i32) {
    %c0_i32 = arith.constant 0 : i32
    %c0_i32_0 = arith.constant 0 : i32
    return %arg0, %c0_i32 : i32, i32
  }
}

module attributes {stable_mosaic.version = 11 : i64} {
  func.func @_freq_upsample_kernel(%arg0: i32, %arg1: memref<8x12xf32, #tpu.memory_space<vmem>>, %arg2: memref<12x256xf32, #tpu.memory_space<vmem>>, %arg3: memref<8x256xf32, #tpu.memory_space<vmem>>) attributes {dimension_semantics = [#tpu.dimension_semantics<parallel>], iteration_bounds = array<i64: 1>, scalar_prefetch = 0 : i64, scratch_operands = 0 : i64, tpu.core_type = #tpu.core_type<tc>, window_params = [{transform_indices = @transform_0, window_bounds = array<i64: 8, 12>}, {pipeline_mode = #tpu.pipeline_mode<synchronous>, transform_indices = @transform_1, window_bounds = array<i64: 12, 256>}, {transform_indices = @transform_2, window_bounds = array<i64: 8, 256>}]} {
    %c0 = arith.constant 0 : index
    %c0_0 = arith.constant 0 : index
    %0 = vector.load %arg1[%c0, %c0_0] : memref<8x12xf32, #tpu.memory_space<vmem>>, vector<8x12xf32>
    %c0_1 = arith.constant 0 : index
    %c0_2 = arith.constant 0 : index
    %1 = vector.load %arg2[%c0_1, %c0_2] : memref<12x256xf32, #tpu.memory_space<vmem>>, vector<12x256xf32>
    %cst = arith.constant dense<0.000000e+00> : vector<8x256xf32>
    %2 = tpu.matmul %0, %1, %cst {dimension_numbers = #tpu.dot_dimension_numbers<[1], [0], [0], [1], [0, 0, 1, 1], [], []>} : vector<8x12xf32>, vector<12x256xf32>, vector<8x256xf32> -> vector<8x256xf32>
    %c0_3 = arith.constant 0 : index
    %c0_4 = arith.constant 0 : index
    %3 = vector.load %arg3[%c0_3, %c0_4] : memref<8x256xf32, #tpu.memory_space<vmem>>, vector<8x256xf32>
    tpu.vector_store %arg3[%c0_3, %c0_4], %2 {strides = array<i32>} : memref<8x256xf32, #tpu.memory_space<vmem>>, vector<8x256xf32>,
    return
  }
  func.func @transform_0(%arg0: i32) -> (i32, i32) {
    %c0_i32 = arith.constant 0 : i32
    %c0_i32_0 = arith.constant 0 : i32
    return %arg0, %c0_i32 : i32, i32
  }
  func.func @transform_1(%arg0: i32) -> (i32, i32) {
    %c0_i32 = arith.constant 0 : i32
    %c0_i32_0 = arith.constant 0 : i32
    %c0_i32_1 = arith.constant 0 : i32
    return %c0_i32, %c0_i32_0 : i32, i32
  }
  func.func @transform_2(%arg0: i32) -> (i32, i32) {
    %c0_i32 = arith.constant 0 : i32
    %c0_i32_0 = arith.constant 0 : i32
    return %arg0, %c0_i32 : i32, i32
  }
}

</mosaic_0001>

<bundles_post_ra>
// kernel: reverse.0
= control target key start
LH: loop header
LB: loop body
LE: loop exit
PB: predicated region body
PF: predicated region fallthrough
CT: control target
= control target key end

     0   :  { %v2_v0 = vlaneseq  ;;  %s99_s0 = inlined_call_operand.vmem [shape: f32[8,15], index: 0, kind: input, shape index: {}]   ;;  %s100_s1 = inlined_call_operand.vmem [shape: f32[8,15], index: 1, kind: output, shape index: {}]  }
   0x1   :  { %v33_v2 = vld [vmem:[%s99_s0] sm:$0xff] }
   0x2   :  { %v3_v1 = vsub.s32 14, %v2_v0 }
   0x4   :  { %4 = vset.pattern.permute.xlu0 %v3_v1 }
   0x5   :  { %39 = vperm.xlu0 %4, %v33_v2  }
  0x77   :  { %v40_v3 = vpop.permute.xlu0 %39 }
  0x78   :  { %71 = vst [vmem:[%s100_s1] sm:$0xff] %v40_v3 }

// kernel: fits_forward.3
= control target key start
LH: loop header
LB: loop body
LE: loop exit
PB: predicated region body
PF: predicated region fallthrough
CT: control target
= control target key end

     0   :  { %vm20_vm0 = vcmask 1043456   ;;  %vm16_vm1 = vcmask 97280   ;;  %s113_s1 = inlined_call_operand.vmem [shape: f32[12,256], index: 1, kind: input, shape index: {}]   ;;  %s114_s0 = inlined_call_operand.vmem [shape: f32[8,12], index: 0, kind: input, shape index: {}]   ;;  %s115_s2 = inlined_call_operand.vmem [shape: f32[8,256], index: 2, kind: output, shape index: {}]  }
   0x1   :  { %v14_v0 = vld [vmem:[%s113_s1 + $0x10] sm:$0xf]  ;;  %v15_v1 = vld [vmem:[%s113_s1 + $0x18] sm:$0xf]  ;;  %v12_v2 = vld [vmem:[%s113_s1] sm:$0xff] }
   0x2   :  { %73 = vmatpush.msk.msra.mxu0 %vm20_vm0, %v14_v0  ;;  %75 = vmatpush.msk.msra.mxu1 %vm20_vm0, %v15_v1  ;;  %v13_v3 = vld [vmem:[%s113_s1 + $0x8] sm:$0xff]  ;;  %v11_v4 = vld [vmem:[%s114_s0] sm:$0xff] }
   0x4   :  { %42 = vmatpush.msra.mxu0 %v12_v2  ;;  %62 = vmatpush.msra.mxu1 %v13_v3 }
   0x5   :  { %74 = vmatmul.msk.f32.vlgmr.msra.gmra.mxu0 %vm16_vm1, %v11_v4  ;;  %76 = vmatmul.msk.f32.vlgmr.msra.gmra.mxu1 %vm16_vm1, %v11_v4 }
  0x82   :  { %v44_v5 = vpop.f32.mrf.mxu0  ;;  %v64_v6 = vpop.f32.mrf.mxu1 }
  0x83   :  { %67 = vst [vmem:[%s115_s2] sm:$0xff] %v44_v5 }
  0x84   :  { %68 = vst [vmem:[%s115_s2 + $0x8] sm:$0xff] %v64_v6 }

// kernel: fits_forward.2
= control target key start
LH: loop header
LB: loop body
LE: loop exit
PB: predicated region body
PF: predicated region fallthrough
CT: control target
= control target key end

     0   :  { %vm9_vm0 = vcmask 130048   ;;  %v55_v2 = vmov 16.0   ;;  %vm41_vm4 = vcmask 7168   ;;  %vm44_vm5 = vcmask 15368   ;;  %s77_s0 = inlined_call_operand.vmem [shape: f32[8,16], index: 0, kind: input, shape index: {}]   ;;  %s78_s1 = inlined_call_operand.vmem [shape: f32[8,2], index: 1, kind: output, shape index: {}]  }
   0x1   :  { %v8_v0 = vld [vmem:[%s77_s0] sm:$0xff]  ;;  %51 = vrcp.f32 %v55_v2 }
   0x2   :  { %v10_v1 = vsel %vm9_vm0, %v8_v0, 0.0 }
   0x3   :  { %11 = vadd.xlane.f32.xlu0 %v10_v1 }
   0x7   :  { %v52_v3 = vpop.eup %51 }
   0x8   :  { %v14_v4 = vmul.f32 16.0, %v52_v3  ;;  %vm18_vm1 = vweird.f32 %v52_v3 }
   0xa   :  { %v15_v5 = vsub.f32 1.0, %v14_v4 }
   0xc   :  { %v16_v6 = vmul.f32 %v52_v3, %v15_v5 }
   0xe   :  { %v17_v7 = vadd.f32 %v52_v3, %v16_v6 }
  0x10   :  { %v19_v8 = vsel %vm18_vm1, %v52_v3, %v17_v7 }
  0x76   :  { %v12_v9 = vpop.xlane.xlu0 %11 }
  0x77   :  { %v20_v10 = vmul.f32 %v19_v8, %v12_v9 }
  0x79   :  { %v21_v11 = vsub.f32 %v8_v0, %v20_v10  ;;  %v43_v28 = vmul.f32 16.0, %v20_v10 }
  0x7b   :  { %v22_v12 = vmul.f32 %v21_v11, %v21_v11 }
  0x7d   :  { %v23_v13 = vsel %vm9_vm0, %v22_v12, 0.0 }
  0x7e   :  { %24 = vadd.xlane.f32.xlu0 %v23_v13 }
  0xf1   :  { %v25_v14 = vpop.xlane.xlu0 %24 }
  0xf2   :  { %v26_v15 = vmul.f32 0.06666667, %v25_v14 }
  0xf4   :  { %v27_v16 = vadd.f32 1e-05, %v26_v15 }
  0xf6   :  { %53 = vrsqrt.f32 %v27_v16  ;;  %vm35_vm2 = vcmp.eq.f32.partialorder %v27_v16, inf  ;;  %v38_v24 = vand.u32 2147483648, %v27_v16  ;;  %vm37_vm3 = vcmp.eq.f32.partialorder %v27_v16, 0.0 }
  0xfc   :  { %v54_v17 = vpop.eup %53 }
  0xfd   :  { %v29_v18 = vmul.f32 %v54_v17, %v27_v16 }
  0xff   :  { %v30_v19 = vmul.f32 %v54_v17, %v29_v18 }
 0x101   :  { %v31_v20 = vmul.f32 0.5, %v30_v19 }
 0x103   :  { %v32_v21 = vsub.f32 1.5, %v31_v20 }
 0x105   :  { %v33_v22 = vmul.f32 %v54_v17, %v32_v21 }
 0x107   :  { %v34_v23 = vmul.f32 %v33_v22, %v27_v16 }
 0x109   :  { %v36_v25 = vsel %vm35_vm2, %v27_v16, %v34_v23 }
 0x10a   :  { %v39_v26 = vsel %vm37_vm3, %v38_v24, %v36_v25 }
 0x10b   :  { %v40_v27 = vmul.f32 2.0, %v39_v26 }
 0x10d   :  { %42 = vst.msk [vmem:[%s78_s1] sm:$0xff] %vm41_vm4, %v40_v27 }
 0x10e   :  { %45 = vst.msk [vmem:[%s78_s1] sm:$0xff] %vm44_vm5, %v43_v28 }

</bundles_post_ra>
